<compile_context>
chip_gen: v7x
topology: tpu7x:2x2x1
jax: 0.10.0
libtpu: 0.0.40
codegen_flags: <defaults>
</compile_context>

<pallas_src>
import functools

import jax
import jax.numpy as jnp
from jax.experimental import pallas as pl
from jax.experimental.pallas import tpu as pltpu

IN_H = IN_W = 12          # fc_in = 196 = 14*14 implies a 12x12 input image
CANVAS = 14               # spatial size after the two k=2, padding=1 convs
FLAT = CANVAS * CANVAS    # 196
FLAT_PAD = 256            # lane-padded flatten length
HIDDEN = 500
HIDDEN_PAD = 512
NUM_ACTIONS = 4           # up, down, left, right
OUT_PAD = 128             # lane-padded logits width
TILE_B = 8                # images per grid step in the batched kernel
N_PIX = float(IN_H * IN_W)


# ----------------------------- in-kernel helpers -----------------------------
def _canvas_masks(shape):
    """m12 (valid 12x12 input) / m13 (valid 13x13 conv1 output) boolean masks
    on the row-major 14-wide flat canvas, built in-kernel from a lane iota
    (exact floor(k/14) via multiply-shift) — no mask DMA / input descriptor."""
    k = jax.lax.broadcasted_iota(jnp.int32, shape, len(shape) - 1)
    i = (k * 4682) >> 16            # == k // 14 exactly for 0 <= k < 5461
    j = k - i * CANVAS
    m12 = (i < IN_H) & (j < IN_W)
    m13 = (i < IN_H + 1) & (j < IN_W + 1)
    return m12, m13


def _conv2x2(v, w00, w01, w10, w11, b):
    """2x2 conv, padding=1, on the row-major flat canvas via lane rolls.
    roll by CANVAS == one row down (in[i-1, j]); roll by 1 == one col right
    (in[i, j-1]).  Wrapped-in lanes are provably zero because the conv input
    is masked to the strict interior of the 14x14 canvas and lanes >= 196 are
    zero, so the wrap reproduces the zero padding exactly."""
    dc = pltpu.roll(v, CANVAS, 1)   # in[i-1, j]
    ce = pltpu.roll(v, 1, 1)        # in[i,   j-1]
    dce = pltpu.roll(dc, 1, 1)      # in[i-1, j-1]
    return w00 * dce + w01 * dc + w10 * ce + w11 * v + b


def _normalize(xp, m12):
    """(x - mean)/std per row with ddof=0 (matches np.mean/np.std in the
    module), via rsqrt(var + eps) multiply; eps guards constant inputs."""
    inv_n = 1.0 / N_PIX
    s1 = jnp.sum(xp, axis=1, keepdims=True)
    s2 = jnp.sum(xp * xp, axis=1, keepdims=True)
    mean = s1 * inv_n
    var = jnp.maximum(s2 * inv_n - mean * mean, 0.0)
    inv_std = jax.lax.rsqrt(var + 1e-12)
    return jnp.where(m12, (xp - mean) * inv_std, 0.0)


def _conv_stack(xp, cp_ref):
    """normalize -> conv1+ReLU (masked to 13x13) -> conv2+ReLU == flatten()."""
    m12, m13 = _canvas_masks(xp.shape)
    cx = _normalize(xp, m12)
    w = cp_ref                       # (16,) SMEM: [w1(4), b1, w2(4), b2, pad]
    o1 = jnp.where(
        m13, jnp.maximum(_conv2x2(cx, w[0], w[1], w[2], w[3], w[4]), 0.0), 0.0)
    o2 = jnp.maximum(_conv2x2(o1, w[5], w[6], w[7], w[8], w[9]), 0.0)
    # o2 IS the torch.flatten() row (k = i*14 + j); ReLU_3 on it is a no-op
    # and lanes >= 196 hit zero rows of the padded fc1 weight.
    return o2


# --------------------------------- kernels -----------------------------------
def _ecnn10_single_kernel(x_ref, cp_ref, wfc1_ref, bfc1_ref, wfc2c_ref, out_ref):
    f32 = jnp.float32
    o2 = _conv_stack(x_ref[...], cp_ref)                          # (1, 256)

    # fully_connected_in: (1,256)bf16 @ (256,512)bf16 -> f32, + bias, ReLU.
    # bfc1 lane 511 == 1.0 so h[511] == 1.0 exactly (constant lane used to
    # fold the fc2 bias / softmax mask into wfc2c column 511).
    h = jnp.maximum(
        jnp.dot(o2.astype(jnp.bfloat16), wfc1_ref[...],
                preferred_element_type=f32) + bfc1_ref[...], 0.0)  # (1, 512)

    # fully_connected_out as a VPU multiply + lane reduce against the compact
    # (8, 512) slab: rows 0..3 = real actions (col 511 = bias), rows 4..7 have
    # only col 511 = -1e30 (softmax mask baked in).
    logits = jnp.sum(h * wfc2c_ref[...], axis=1, keepdims=True)    # (8, 1)
    mmax = jnp.max(logits, axis=0, keepdims=True)
    e = jnp.exp(logits - mmax)
    inv = 1.0 / jnp.sum(e, axis=0, keepdims=True)                  # exact recip
    out_ref[...] = jnp.broadcast_to(e * inv, (8, OUT_PAD))         # lane-dense


def _ecnn10_batched_kernel(x_ref, cp_ref, wfc1_ref, bfc1_ref,
                           wfc2p_ref, bfc2p_ref, out_ref):
    f32 = jnp.float32
    o2 = _conv_stack(x_ref[...], cp_ref)                          # (TILE_B, 256)
    h = jnp.maximum(
        jnp.dot(o2.astype(jnp.bfloat16), wfc1_ref[...],
                preferred_element_type=f32) + bfc1_ref[...], 0.0)  # (TILE_B, 512)
    # padded fc2 MXU matmul; bias has -1e30 baked into lanes >= num_actions,
    # weight row 511 is zero so the constant-1 lane of h is harmless.
    logits = (jnp.dot(h.astype(jnp.bfloat16), wfc2p_ref[...],
                      preferred_element_type=f32) + bfc2p_ref[...])
    mmax = jnp.max(logits, axis=1, keepdims=True)
    e = jnp.exp(logits - mmax)
    out_ref[...] = e * (1.0 / jnp.sum(e, axis=1, keepdims=True))


# --------------------------- parameter preparation ---------------------------
def prepare_params(params, num_actions=NUM_ACTIONS):
    """One-time weight layout prep (transpose / pad / bf16 cast / bias+mask
    baking).  Kept OUT of the per-call hot path."""
    assert num_actions <= 8 and num_actions <= OUT_PAD
    f32, bf16 = jnp.float32, jnp.bfloat16

    # All four conv tensors packed into one SMEM scalar vector (one descriptor).
    cparams = jnp.concatenate([
        jnp.asarray(params["conv1_w"], f32).reshape(-1),
        jnp.asarray(params["conv1_b"], f32).reshape(-1),
        jnp.asarray(params["conv2_w"], f32).reshape(-1),
        jnp.asarray(params["conv2_b"], f32).reshape(-1),
        jnp.zeros((6,), f32)])                                     # (16,)

    fc1_w = jnp.asarray(params["fc1_w"], f32)      # (500, 196) torch layout
    fc1_b = jnp.asarray(params["fc1_b"], f32)      # (500,)
    fc2_w = jnp.asarray(params["fc2_w"], f32)      # (A, 500)
    fc2_b = jnp.asarray(params["fc2_b"], f32)      # (A,)

    wfc1 = (jnp.zeros((FLAT_PAD, HIDDEN_PAD), f32)
            .at[:FLAT, :HIDDEN].set(fc1_w.T).astype(bf16))         # 256 KB bf16
    bfc1 = (jnp.zeros((1, HIDDEN_PAD), f32)
            .at[0, :HIDDEN].set(fc1_b)
            .at[0, HIDDEN_PAD - 1].set(1.0))       # constant-1 lane -> h[511]==1

    # Compact fc2 for the single-image path (16 KB instead of 256 KB f32):
    # bias + softmax mask baked into column 511.
    wfc2c = (jnp.zeros((8, HIDDEN_PAD), f32)
             .at[:num_actions, :HIDDEN].set(fc2_w)
             .at[:num_actions, HIDDEN_PAD - 1].set(fc2_b)
             .at[num_actions:, HIDDEN_PAD - 1].set(-1e30))

    # Lane-padded fc2 for the batched MXU path (DMA'd once per call, resident
    # across the whole grid); softmax mask lives in the bias.
    wfc2p = (jnp.zeros((HIDDEN_PAD, OUT_PAD), f32)
             .at[:HIDDEN, :num_actions].set(fc2_w.T).astype(bf16))
    bfc2p = (jnp.full((1, OUT_PAD), -1e30, f32)
             .at[0, :num_actions].set(fc2_b))

    return {"cparams": cparams, "wfc1": wfc1, "bfc1": bfc1,
            "wfc2c": wfc2c, "wfc2p": wfc2p, "bfc2p": bfc2p}


def _embed_canvas(x):
    """(B, 12, 12) images -> (B, 256) row-major 14-wide flat canvases."""
    x = jnp.asarray(x, jnp.float32)
    b = x.shape[0]
    x = jnp.pad(x, ((0, 0), (0, 0), (0, CANVAS - IN_W)))
    x = x.reshape(b, IN_H * CANVAS)
    return jnp.pad(x, ((0, 0), (0, FLAT_PAD - IN_H * CANVAS)))


# -------------------------------- entry points --------------------------------
@functools.partial(jax.jit, static_argnames=("num_actions",))
def ecnn10_forward(x, prep, num_actions=NUM_ACTIONS):
    """Single-image forward (module semantics).  x: (12, 12) -> (1, A)."""
    xflat = _embed_canvas(x[None, ...])
    vmem = pl.BlockSpec(memory_space=pltpu.MemorySpace.VMEM)
    smem = pl.BlockSpec(memory_space=pltpu.MemorySpace.SMEM)
    out = pl.pallas_call(
        _ecnn10_single_kernel,
        out_shape=jax.ShapeDtypeStruct((8, OUT_PAD), jnp.float32),
        in_specs=[vmem, smem, vmem, vmem, vmem],
        out_specs=vmem,
    )(xflat, prep["cparams"], prep["wfc1"], prep["bfc1"], prep["wfc2c"])
    # probabilities live on sublanes 0..num_actions-1 (broadcast across lanes)
    return out[:num_actions, 0][None, :]


@functools.partial(jax.jit, static_argnames=("num_actions",))
def ecnn10_forward_batched(x, prep, num_actions=NUM_ACTIONS):
    """Batched forward.  x: (B, 12, 12) -> (B, A).  Weights are DMA'd once per
    call (constant-index BlockSpecs) and stay VMEM-resident across the grid;
    the batch axis is 'parallel' so a v7x megacore uses both TensorCores."""
    b = x.shape[0]
    bp = pl.cdiv(b, TILE_B) * TILE_B
    xflat = jnp.pad(_embed_canvas(x), ((0, bp - b), (0, 0)))
    out = pl.pallas_call(
        _ecnn10_batched_kernel,
        out_shape=jax.ShapeDtypeStruct((bp, OUT_PAD), jnp.float32),
        grid=(bp // TILE_B,),
        in_specs=[
            pl.BlockSpec((TILE_B, FLAT_PAD), lambda i: (i, 0)),
            pl.BlockSpec(memory_space=pltpu.MemorySpace.SMEM),
            pl.BlockSpec((FLAT_PAD, HIDDEN_PAD), lambda i: (0, 0)),
            pl.BlockSpec((1, HIDDEN_PAD), lambda i: (0, 0)),
            pl.BlockSpec((HIDDEN_PAD, OUT_PAD), lambda i: (0, 0)),
            pl.BlockSpec((1, OUT_PAD), lambda i: (0, 0)),
        ],
        out_specs=pl.BlockSpec((TILE_B, OUT_PAD), lambda i: (i, 0)),
        compiler_params=pltpu.CompilerParams(dimension_semantics=("parallel",)),
    )(xflat, prep["cparams"], prep["wfc1"], prep["bfc1"],
      prep["wfc2p"], prep["bfc2p"])
    return out[:b, :num_actions]


# ---------------------------- synthetic params / ref --------------------------
def init_params(key, num_actions=NUM_ACTIONS):
    """Deterministic synthetic parameters with the shapes from ECNN10.__init__."""
    ks = jax.random.split(key, 8)

    def u(k, shape, fan_in):
        bound = 1.0 / (fan_in ** 0.5)
        return jax.random.uniform(k, shape, jnp.float32, -bound, bound)

    return {
        "conv1_w": u(ks[0], (2, 2), 4),            # nn.Conv2d(1,1,2) weight (squeezed)
        "conv1_b": u(ks[1], (1,), 4),
        "conv2_w": u(ks[2], (2, 2), 4),
        "conv2_b": u(ks[3], (1,), 4),
        "fc1_w": u(ks[4], (HIDDEN, FLAT), FLAT),   # torch Linear layout (out, in)
        "fc1_b": u(ks[5], (HIDDEN,), FLAT),
        "fc2_w": u(ks[6], (num_actions, HIDDEN), HIDDEN),
        "fc2_b": u(ks[7], (num_actions,), HIDDEN),
    }


def ecnn10_reference(x, params):
    """Pure-JAX f32 reference mirroring the PyTorch forward, for validation."""
    x = x.astype(jnp.float32)
    xn = (x - jnp.mean(x)) / jnp.std(x)            # np.mean / np.std (ddof=0)

    def conv(a, w, b):
        h, wdt = a.shape
        p = jnp.pad(a, 1)
        out = b[0]
        out = out + w[0, 0] * p[0:h + 1, 0:wdt + 1]
        out = out + w[0, 1] * p[0:h + 1, 1:wdt + 2]
        out = out + w[1, 0] * p[1:h + 2, 0:wdt + 1]
        out = out + w[1, 1] * p[1:h + 2, 1:wdt + 2]
        return out

    o1 = jax.nn.relu(conv(xn, params["conv1_w"], params["conv1_b"]))
    o2 = jax.nn.relu(conv(o1, params["conv2_w"], params["conv2_b"]))
    flat = jax.nn.relu(o2.reshape(1, -1))
    h = jax.nn.relu(flat @ params["fc1_w"].T + params["fc1_b"][None, :])
    logits = h @ params["fc2_w"].T + params["fc2_b"][None, :]
    return jax.nn.softmax(logits, axis=1)


if __name__ == "__main__":
    key = jax.random.PRNGKey(0)
    kx, kp, kb = jax.random.split(key, 3)

    params = init_params(kp, num_actions=NUM_ACTIONS)
    prep = prepare_params(params, num_actions=NUM_ACTIONS)

    # --- single-image path (module semantics) --------------------------------
    x = jax.random.normal(kx, (IN_H, IN_W), jnp.float32)
    out = jax.block_until_ready(ecnn10_forward(x, prep))
    ref = ecnn10_reference(x, params)
    assert out.shape == (1, NUM_ACTIONS)
    assert bool(jnp.allclose(jnp.sum(out), 1.0, atol=1e-4))
    # bf16 fc1 weights -> tolerance relaxed vs the pure-f32 reference
    assert bool(jnp.allclose(out, ref, rtol=3e-2, atol=3e-3)), (out, ref)

    # --- batched path (weights resident across the grid) ---------------------
    xb = jax.random.normal(kb, (5, IN_H, IN_W), jnp.float32)
    outb = jax.block_until_ready(ecnn10_forward_batched(xb, prep))
    refb = jnp.concatenate(
        [ecnn10_reference(xb[i], params) for i in range(xb.shape[0])], axis=0)
    assert outb.shape == (xb.shape[0], NUM_ACTIONS)
    assert bool(jnp.allclose(outb, refb, rtol=3e-2, atol=3e-3)), (outb, refb)

    print("KERNEL_OK")
</pallas_src>

<mosaic_0001>
module attributes {stable_mosaic.version = 11 : i64} {
  func.func @_ecnn10_single_kernel(%arg0: memref<1x256xf32, #tpu.memory_space<vmem>>, %arg1: memref<16xf32, #tpu.memory_space<smem>>, %arg2: memref<256x512xbf16, #tpu.memory_space<vmem>>, %arg3: memref<1x512xf32, #tpu.memory_space<vmem>>, %arg4: memref<8x512xf32, #tpu.memory_space<vmem>>, %arg5: memref<8x128xf32, #tpu.memory_space<vmem>>) attributes {dimension_semantics = [], scalar_prefetch = 0 : i64, scratch_operands = 0 : i64, tpu.core_type = #tpu.core_type<tc>} {
    %c0 = arith.constant 0 : index
    %c0_0 = arith.constant 0 : index
    %0 = vector.load %arg0[%c0, %c0_0] : memref<1x256xf32, #tpu.memory_space<vmem>>, vector<1x256xf32>
    %1 = tpu.iota {dimensions = array<i32: 1>} : vector<1x256xi32>
    %c4682_i32 = arith.constant 4682 : i32
    %2 = vector.broadcast %c4682_i32 : i32 to vector<1x256xi32>
    %3 = arith.muli %1, %2 : vector<1x256xi32>
    %c16_i32 = arith.constant 16 : i32
    %4 = vector.broadcast %c16_i32 : i32 to vector<1x256xi32>
    %5 = arith.shrsi %3, %4 : vector<1x256xi32>
    %c14_i32 = arith.constant 14 : i32
    %6 = vector.broadcast %c14_i32 : i32 to vector<1x256xi32>
    %7 = arith.muli %5, %6 : vector<1x256xi32>
    %8 = arith.subi %1, %7 : vector<1x256xi32>
    %c12_i32 = arith.constant 12 : i32
    %9 = vector.broadcast %c12_i32 : i32 to vector<1x256xi32>
    %10 = arith.cmpi slt, %5, %9 : vector<1x256xi32>
    %c12_i32_1 = arith.constant 12 : i32
    %11 = vector.broadcast %c12_i32_1 : i32 to vector<1x256xi32>
    %12 = arith.cmpi slt, %8, %11 : vector<1x256xi32>
    %13 = arith.andi %10, %12 : vector<1x256xi1>
    %c13_i32 = arith.constant 13 : i32
    %14 = vector.broadcast %c13_i32 : i32 to vector<1x256xi32>
    %15 = arith.cmpi slt, %5, %14 : vector<1x256xi32>
    %c13_i32_2 = arith.constant 13 : i32
    %16 = vector.broadcast %c13_i32_2 : i32 to vector<1x256xi32>
    %17 = arith.cmpi slt, %8, %16 : vector<1x256xi32>
    %18 = arith.andi %15, %17 : vector<1x256xi1>
    %cst = arith.constant dense<0.000000e+00> : vector<1xf32>
    %19 = vector.multi_reduction <add>, %0, %cst [1] : vector<1x256xf32> to vector<1xf32>
    %20 = vector.shape_cast %19 : vector<1xf32> to vector<1x1xf32>
    %21 = arith.mulf %0, %0 : vector<1x256xf32>
    %cst_3 = arith.constant dense<0.000000e+00> : vector<1xf32>
    %22 = vector.multi_reduction <add>, %21, %cst_3 [1] : vector<1x256xf32> to vector<1xf32>
    %23 = vector.shape_cast %22 : vector<1xf32> to vector<1x1xf32>
    %cst_4 = arith.constant 0.0069444445 : f32
    %24 = vector.broadcast %cst_4 : f32 to vector<1x1xf32>
    %25 = arith.mulf %20, %24 : vector<1x1xf32>
    %cst_5 = arith.constant 0.0069444445 : f32
    %26 = vector.broadcast %cst_5 : f32 to vector<1x1xf32>
    %27 = arith.mulf %23, %26 : vector<1x1xf32>
    %28 = arith.mulf %25, %25 : vector<1x1xf32>
    %29 = arith.subf %27, %28 : vector<1x1xf32>
    %cst_6 = arith.constant 0.000000e+00 : f32
    %30 = vector.broadcast %cst_6 : f32 to vector<1x1xf32>
    %31 = arith.maximumf %29, %30 : vector<1x1xf32>
    %cst_7 = arith.constant 9.99999996E-13 : f32
    %32 = vector.broadcast %cst_7 : f32 to vector<1x1xf32>
    %33 = arith.addf %31, %32 : vector<1x1xf32>
    %34 = math.rsqrt %33 : vector<1x1xf32>
    %35 = vector.broadcast %25 : vector<1x1xf32> to vector<1x256xf32>
    %36 = arith.subf %0, %35 : vector<1x256xf32>
    %37 = vector.broadcast %34 : vector<1x1xf32> to vector<1x256xf32>
    %38 = arith.mulf %36, %37 : vector<1x256xf32>
    %cst_8 = arith.constant 0.000000e+00 : f32
    %39 = vector.broadcast %cst_8 : f32 to vector<1x256xf32>
    %40 = arith.select %13, %38, %39 : vector<1x256xi1>, vector<1x256xf32>
    %c0_9 = arith.constant 0 : index
    %41 = memref.load %arg1[%c0_9] : memref<16xf32, #tpu.memory_space<smem>>
    %c1 = arith.constant 1 : index
    %42 = memref.load %arg1[%c1] : memref<16xf32, #tpu.memory_space<smem>>
    %c2 = arith.constant 2 : index
    %43 = memref.load %arg1[%c2] : memref<16xf32, #tpu.memory_space<smem>>
    %c3 = arith.constant 3 : index
    %44 = memref.load %arg1[%c3] : memref<16xf32, #tpu.memory_space<smem>>
    %c4 = arith.constant 4 : index
    %45 = memref.load %arg1[%c4] : memref<16xf32, #tpu.memory_space<smem>>
    %c14_i32_10 = arith.constant 14 : i32
    %46 = tpu.dynamic_rotate %40 by %c14_i32_10 dim 1 : vector<1x256xf32>, i32 -> vector<1x256xf32>
    %c1_i32 = arith.constant 1 : i32
    %47 = tpu.dynamic_rotate %40 by %c1_i32 dim 1 : vector<1x256xf32>, i32 -> vector<1x256xf32>
    %c1_i32_11 = arith.constant 1 : i32
    %48 = tpu.dynamic_rotate %46 by %c1_i32_11 dim 1 : vector<1x256xf32>, i32 -> vector<1x256xf32>
    %49 = vector.broadcast %41 : f32 to vector<1x256xf32>
    %50 = arith.mulf %49, %48 : vector<1x256xf32>
    %51 = vector.broadcast %42 : f32 to vector<1x256xf32>
    %52 = arith.mulf %51, %46 : vector<1x256xf32>
    %53 = arith.addf %50, %52 : vector<1x256xf32>
    %54 = vector.broadcast %43 : f32 to vector<1x256xf32>
    %55 = arith.mulf %54, %47 : vector<1x256xf32>
    %56 = arith.addf %53, %55 : vector<1x256xf32>
    %57 = vector.broadcast %44 : f32 to vector<1x256xf32>
    %58 = arith.mulf %57, %40 : vector<1x256xf32>
    %59 = arith.addf %56, %58 : vector<1x256xf32>
    %60 = vector.broadcast %45 : f32 to vector<1x256xf32>
    %61 = arith.addf %59, %60 : vector<1x256xf32>
    %cst_12 = arith.constant 0.000000e+00 : f32
    %62 = vector.broadcast %cst_12 : f32 to vector<1x256xf32>
    %63 = arith.maximumf %61, %62 : vector<1x256xf32>
    %cst_13 = arith.constant 0.000000e+00 : f32
    %64 = vector.broadcast %cst_13 : f32 to vector<1x256xf32>
    %65 = arith.select %18, %63, %64 : vector<1x256xi1>, vector<1x256xf32>
    %c5 = arith.constant 5 : index
    %66 = memref.load %arg1[%c5] : memref<16xf32, #tpu.memory_space<smem>>
    %c6 = arith.constant 6 : index
    %67 = memref.load %arg1[%c6] : memref<16xf32, #tpu.memory_space<smem>>
    %c7 = arith.constant 7 : index
    %68 = memref.load %arg1[%c7] : memref<16xf32, #tpu.memory_space<smem>>
    %c8 = arith.constant 8 : index
    %69 = memref.load %arg1[%c8] : memref<16xf32, #tpu.memory_space<smem>>
    %c9 = arith.constant 9 : index
    %70 = memref.load %arg1[%c9] : memref<16xf32, #tpu.memory_space<smem>>
    %c14_i32_14 = arith.constant 14 : i32
    %71 = tpu.dynamic_rotate %65 by %c14_i32_14 dim 1 : vector<1x256xf32>, i32 -> vector<1x256xf32>
    %c1_i32_15 = arith.constant 1 : i32
    %72 = tpu.dynamic_rotate %65 by %c1_i32_15 dim 1 : vector<1x256xf32>, i32 -> vector<1x256xf32>
    %c1_i32_16 = arith.constant 1 : i32
    %73 = tpu.dynamic_rotate %71 by %c1_i32_16 dim 1 : vector<1x256xf32>, i32 -> vector<1x256xf32>
    %74 = vector.broadcast %66 : f32 to vector<1x256xf32>
    %75 = arith.mulf %74, %73 : vector<1x256xf32>
    %76 = vector.broadcast %67 : f32 to vector<1x256xf32>
    %77 = arith.mulf %76, %71 : vector<1x256xf32>
    %78 = arith.addf %75, %77 : vector<1x256xf32>
    %79 = vector.broadcast %68 : f32 to vector<1x256xf32>
    %80 = arith.mulf %79, %72 : vector<1x256xf32>
    %81 = arith.addf %78, %80 : vector<1x256xf32>
    %82 = vector.broadcast %69 : f32 to vector<1x256xf32>
    %83 = arith.mulf %82, %65 : vector<1x256xf32>
    %84 = arith.addf %81, %83 : vector<1x256xf32>
    %85 = vector.broadcast %70 : f32 to vector<1x256xf32>
    %86 = arith.addf %84, %85 : vector<1x256xf32>
    %cst_17 = arith.constant 0.000000e+00 : f32
    %87 = vector.broadcast %cst_17 : f32 to vector<1x256xf32>
    %88 = arith.maximumf %86, %87 : vector<1x256xf32>
    %89 = arith.truncf %88 : vector<1x256xf32> to vector<1x256xbf16>
    %c0_18 = arith.constant 0 : index
    %c0_19 = arith.constant 0 : index
    %90 = vector.load %arg2[%c0_18, %c0_19] : memref<256x512xbf16, #tpu.memory_space<vmem>>, vector<256x512xbf16>
    %cst_20 = arith.constant dense<0.000000e+00> : vector<1x512xf32>
    %91 = tpu.matmul %89, %90, %cst_20 {dimension_numbers = #tpu.dot_dimension_numbers<[1], [0], [0], [1], [0, 0, 1, 1], [], []>} : vector<1x256xbf16>, vector<256x512xbf16>, vector<1x512xf32> -> vector<1x512xf32>
    %c0_21 = arith.constant 0 : index
    %c0_22 = arith.constant 0 : index
    %92 = vector.load %arg3[%c0_21, %c0_22] : memref<1x512xf32, #tpu.memory_space<vmem>>, vector<1x512xf32>
    %93 = arith.addf %91, %92 : vector<1x512xf32>
    %cst_23 = arith.constant 0.000000e+00 : f32
    %94 = vector.broadcast %cst_23 : f32 to vector<1x512xf32>
    %95 = arith.maximumf %93, %94 : vector<1x512xf32>
    %c0_24 = arith.constant 0 : index
    %c0_25 = arith.constant 0 : index
    %96 = vector.load %arg4[%c0_24, %c0_25] : memref<8x512xf32, #tpu.memory_space<vmem>>, vector<8x512xf32>
    %97 = vector.broadcast %95 : vector<1x512xf32> to vector<8x512xf32>
    %98 = arith.mulf %97, %96 : vector<8x512xf32>
    %cst_26 = arith.constant dense<0.000000e+00> : vector<8xf32>
    %99 = vector.multi_reduction <add>, %98, %cst_26 [1] : vector<8x512xf32> to vector<8xf32>
    %100 = vector.shape_cast %99 : vector<8xf32> to vector<8x1xf32>
    %cst_27 = arith.constant dense<0xFF800000> : vector<1xf32>
    %101 = vector.multi_reduction <maximumf>, %100, %cst_27 [0] : vector<8x1xf32> to vector<1xf32>
    %102 = vector.shape_cast %101 : vector<1xf32> to vector<1x1xf32>
    %103 = vector.broadcast %102 : vector<1x1xf32> to vector<8x1xf32>
    %104 = arith.subf %100, %103 : vector<8x1xf32>
    %105 = math.exp %104 : vector<8x1xf32>
    %cst_28 = arith.constant dense<0.000000e+00> : vector<1xf32>
    %106 = vector.multi_reduction <add>, %105, %cst_28 [0] : vector<8x1xf32> to vector<1xf32>
    %107 = vector.shape_cast %106 : vector<1xf32> to vector<1x1xf32>
    %cst_29 = arith.constant 1.000000e+00 : f32
    %108 = vector.broadcast %cst_29 : f32 to vector<1x1xf32>
    %109 = arith.divf %108, %107 : vector<1x1xf32>
    %110 = vector.broadcast %109 : vector<1x1xf32> to vector<8x1xf32>
    %111 = arith.mulf %105, %110 : vector<8x1xf32>
    %112 = vector.shape_cast %111 : vector<8x1xf32> to vector<8x1xf32>
    %113 = vector.broadcast %112 : vector<8x1xf32> to vector<8x128xf32>
    %c0_30 = arith.constant 0 : index
    %c0_31 = arith.constant 0 : index
    %114 = vector.load %arg5[%c0_30, %c0_31] : memref<8x128xf32, #tpu.memory_space<vmem>>, vector<8x128xf32>
    tpu.vector_store %arg5[%c0_30, %c0_31], %113 {strides = array<i32>} : memref<8x128xf32, #tpu.memory_space<vmem>>, vector<8x128xf32>,
    return
  }
}

</mosaic_0001>

<bundles_post_ra>
// kernel: ecnn10_forward.1
= control target key start
LH: loop header
LB: loop body
LE: loop exit
PB: predicated region body
PF: predicated region fallthrough
CT: control target
= control target key end

     0   :  { %10 = vsyncpa [#allocation4], 0  ;;  %s1171_s0 = inlined_call_operand.vmem [shape: f32[1,256], index: 0, kind: input, shape index: {}]   ;;  %s1172_s1 = inlined_call_operand.vmem [shape: f32[16], index: 1, kind: input, shape index: {}]   ;;  %s1173_s2 = inlined_call_operand.hbm [shape: bf16[256,512], index: 2, kind: input, shape index: {}]   ;;  %s1174_s3 = inlined_call_operand.vmem [shape: f32[1,512], index: 3, kind: input, shape index: {}]   ;;  %s1175_s4 = inlined_call_operand.vmem [shape: f32[8,512], index: 4, kind: input, shape index: {}]   ;;  %s1176_s5 = inlined_call_operand.vmem [shape: f32[8,128], index: 5, kind: output, shape index: {}]  }
   0x1   :  { %s20_s20 = sshll.u32 %s1172_s1, 4  ;;  %s21_s20 = int_to_ptr.vmem [resolvable:$true] %s20_s20 }
   0x2   :  { %11 = vsyncpa [#allocation3], 0  ;;  %s964_s21 = scalar_lea.vmem %s21_s20, 16  ;;  %p969_p1 = scmp.lt.s32.totalorder %s21_s20, %s21_s20 }
   0x3   :  { %p965_p0 = scmp.ne.s32.totalorder %s21_s20, %s964_s21  ;;  %p970_p2 = scmp.lt.s32.totalorder %s964_s21, %s964_s21 }
   0x5   :  { %p971_p3 = por %p970_p2, %p969_p1 }
   0x7   :  { %p972_p4 = pnand %p971_p3, %p965_p0 }
   0x9   :  { %975 = shalt.err (!%p972_p4)
}
   0xa   :  { %s1002_s22 = smov [#allocation2]   ;;  %s1003_s23 = smov [#allocation5]  }
   0xb   :  { %23 = dma.vmem_to_smem %s21_s20, 16, %s1002_s22, [#allocation4]  }
   0xc   :  { %s29_s24 = sshll.u32 %s1003_s23, 4  ;;  %s976_s27 = scalar_lea.hbm %s1173_s2, 8192  ;;  %s30_s24 = int_to_ptr.vmem [resolvable:$true] %s29_s24 }
   0xd   :  { %p977_p5 = scmp.ne.s32.totalorder %s1173_s2, %s976_s27  ;;  %p980_p6 = scmp.lt.u32.totalorder %s976_s27, %s1173_s2 }
   0xf   :  { %p982_p7 = pnand %p980_p6, %p977_p5 }
  0x11   :  { %985 = shalt.err (!%p982_p7)
}
  0x12   :  { %s986_s6 = scalar_lea.vmem %s30_s24, 8192  ;;  %p991_p9 = scmp.lt.s32.totalorder %s30_s24, %s30_s24 }
  0x13   :  { %p987_p8 = scmp.ne.s32.totalorder %s30_s24, %s986_s6  ;;  %p992_p10 = scmp.lt.s32.totalorder %s986_s6, %s986_s6 }
  0x15   :  { %p993_p11 = por %p992_p10, %p991_p9 }
  0x17   :  { %p994_p12 = pnand %p993_p11, %p987_p8 }
  0x19   :  { %997 = shalt.err (!%p994_p12)
}
  0x1a   :  { %s1004_s7 = smov 256   ;;  %s1005_s8 = smov 16  }
  0x1b   :  { %35 = dma.hbm_to_vmem [thread:$0]  %s1173_s2, 8192, %s30_s24, [#allocation3], %s1004_s7, %s1004_s7, %s1005_s8  }
  0x1c   :  { %998 = dma.done.wait [#allocation4], 16  }
  0x1d   :  { %999 = vsyncadd [#allocation4], 4294967280 }
  0x1e   :  { %1000 = dma.done.wait [#allocation3], 8192  }
  0x1f   :  { %1001 = vsyncadd [#allocation3], 4294959104 }
  0x20   :  { %46 = sfence }
  0x21   :  { %v47_v0 = vld [vmem:[%s1171_s0] sm:$0x3]  ;;  %v48_v1 = vlaneseq  ;;  %vm82_vm0 = vcmask 1040384   ;;  %s1006_s0 = smov 14   ;;  %s1007_s2 = smov 1  }
  0x22   :  { %v88_v3 = vmul.f32 %v47_v0, %v47_v0  ;;  %s139_s13 = sld [smem:[#allocation2]]  ;;  %s783_s14 = sld [smem:[#allocation2 + $0x1]] }
  0x23   :  { %v1056_v2 = vshrl.u32 %v48_v1, 7  ;;  %v1068_v19 = vand.u32 127, %v48_v1  ;;  %s784_s15 = sld [smem:[#allocation2 + $0x2]]  ;;  %s785_s16 = sld [smem:[#allocation2 + $0x3]] }
  0x24   :  { %s786_s17 = sld [smem:[#allocation2 + $0x4]]  ;;  %s787_s18 = sld [smem:[#allocation2 + $0x5]] }
  0x25   :  { %v1059_v4 = vsub.s32 0, %v1056_v2  ;;  %v1062_v5 = vsub.s32 1, %v1056_v2  ;;  %v51_v23 = vmul.u32 4682, %v1068_v19  ;;  %v50_v24 = vadd.s32 128, %v1068_v19  ;;  %s788_s19 = sld [smem:[#allocation2 + $0x6]]  ;;  %s789_s20 = sld [smem:[#allocation2 + $0x7]] }
  0x26   :  { %vm148_vm7 = vcmp.lt.s32.totalorder %v1068_v19, 14  ;;  %vm155_vm8 = vcmp.lt.s32.totalorder %v1068_v19, 1  ;;  %s790_s21 = sld [smem:[#allocation2 + $0x8]]  ;;  %s791_s22 = sld [smem:[#allocation2 + $0x9]] }
  0x27   :  { %v75_v6 = vrot.slane %v47_v0, %v1059_v4  ;;  %v79_v7 = vrot.slane %v47_v0, %v1062_v5  ;;  %v93_v8 = vrot.slane %v88_v3, %v1059_v4  ;;  %v97_v9 = vrot.slane %v88_v3, %v1062_v5 }
  0x28   :  { %v1072_v27 = vshra.s32 %v51_v23, 16  ;;  %v52_v28 = vmul.u32 4682, %v50_v24  ;;  %v164_v48 = vstv %s139_s13  ;;  %v167_v51 = vstv %s783_s14 }
  0x29   :  { %v83_v10 = vsel %vm82_vm0, %v75_v6, 0.0  ;;  %v84_v11 = vsel %vm82_vm0, %v79_v7, 0.0  ;;  %v100_v12 = vsel %vm82_vm0, %v93_v8, 0.0  ;;  %v101_v13 = vsel %vm82_vm0, %v97_v9, 0.0 }
  0x2a   :  { %v85_v14 = vadd.f32 %v84_v11, %v83_v10  ;;  %v102_v15 = vadd.f32 %v101_v13, %v100_v12  ;;  %v55_v29 = vmul.u32 14, %v1072_v27  ;;  %v1075_v30 = vshra.s32 %v52_v28, 16  ;;  %v876_v28 = vld [vmem:[#allocation5 + $0x4c] ss:$16 sps:$4 sm:$0xff]  }
  0x2b   :  { %vm59_vm1 = vcmp.lt.s32.totalorder %v1072_v27, 12  ;;  %v172_v56 = vstv %s784_s15  ;;  %v177_v60 = vstv %s785_s16  ;;  %vm65_vm9 = vcmp.lt.s32.totalorder %v1072_v27, 13  ;;  %v874_v27 = vld [vmem:[#allocation5 + $0x44] ss:$16 sps:$4 sm:$0xff]  }
  0x2c   :  { %86 = vadd.xlane.f32.xlu0 %v85_v14  ;;  %v1079_v32 = vsub.s32 %v1068_v19, %v55_v29  ;;  %v56_v33 = vmul.u32 14, %v1075_v30  ;;  %vm60_vm4 = vcmp.lt.s32.totalorder %v1075_v30, 12  ;;  %v182_v10 = vstv %s786_s17 }
  0x2d   :  { %vm66_vm12 = vcmp.lt.s32.totalorder %v1075_v30, 13  ;;  %v884_v30 = vld [vmem:[#allocation5 + $0x60] ss:$16 sps:$4 sm:$0xff]  }
  0x2e   :  { %vm61_vm2 = vcmp.lt.s32.totalorder %v1079_v32, 12  ;;  %v1085_v37 = vsub.s32 %v50_v24, %v56_v33  ;;  %vm67_vm10 = vcmp.lt.s32.totalorder %v1079_v32, 13  ;;  %v879_v32 = vld [vmem:[#allocation5 + $0x48] ss:$16 sps:$4 sm:$0xff]   ;;  %v880_v33 = vld [vmem:[#allocation5 + $0x64] ss:$16 sps:$4 sm:$0xff]  }
  0x2f   :  { %vm63_vm3 = vmand %vm59_vm1, %vm61_vm2 }
  0x30   :  { %103 = vadd.xlane.f32.xlu0 %v102_v15  ;;  %vm62_vm5 = vcmp.lt.s32.totalorder %v1085_v37, 12  ;;  %vm69_vm11 = vmand %vm65_vm9, %vm67_vm10  ;;  %v862_v15 = vld [vmem:[#allocation5 + $0x4] ss:$16 sps:$4 sm:$0xff]   ;;  %vm68_vm13 = vcmp.lt.s32.totalorder %v1085_v37, 13  ;;  %v888_v37 = vld [vmem:[#allocation5 + $0x8c] ss:$16 sps:$4 sm:$0xff]  }
  0x31   :  { %vm64_vm6 = vmand %vm60_vm4, %vm62_vm5  ;;  %643 = vmatprep.subr.bf16.mxu0 %v862_v15 }
  0x32   :  { %vm70_vm14 = vmand %vm66_vm12, %vm68_vm13 }
  0xb9   :  { %v87_v16 = vpop.xlane.xlu0 %86 }
  0xba   :  { %v105_v17 = vmul.f32 0.0069444445, %v87_v16  ;;  %v864_v16 = vld [vmem:[#allocation5 + $0xc] ss:$16 sps:$4 sm:$0xff]  }
  0xbb   :  { %684 = vmatprep.subr.bf16.mxu1 %v864_v16  ;;  %v946_v16 = vld [vmem:[#allocation5 + $0x1c4] ss:$16 sps:$4 sm:$0xff]  }
  0xbc   :  { %v107_v20 = vmul.f32 %v105_v17, %v105_v17  ;;  %v116_v31 = vrot.slane %v105_v17, %v1059_v4  ;;  %v866_v17 = vld [vmem:[#allocation5] ss:$16 sps:$4 sm:$0xff]  }
  0xbd   :  { %v104_v18 = vpop.xlane.xlu0 %103  ;;  %644 = vmatpush1.bf16.msra.mxu0 %v866_v17  ;;  %v948_v17 = vld [vmem:[#allocation5 + $0x1cc] ss:$16 sps:$4 sm:$0xff]  }
  0xbe   :  { %v106_v21 = vmul.f32 0.0069444445, %v104_v18  ;;  %v118_v35 = vsub.f32 %v47_v0, %v116_v31  ;;  %v878_v31 = vld [vmem:[#allocation5 + $0x40] ss:$16 sps:$4 sm:$0xff]  }
  0xc0   :  { %v108_v22 = vsub.f32 %v106_v21, %v107_v20  ;;  %v867_v20 = vld [vmem:[#allocation5 + $0x8] ss:$16 sps:$4 sm:$0xff]   ;;  %v868_v21 = vld [vmem:[#allocation5 + $0x24] ss:$16 sps:$4 sm:$0xff]  }
  0xc1   :  { %685 = vmatpush1.bf16.msra.mxu1 %v867_v20  ;;  %645 = vmatprep.subr.bf16.mxu0 %v868_v21  ;;  %v951_v20 = vld [vmem:[#allocation5 + $0x1c8] ss:$16 sps:$4 sm:$0xff]   ;;  %v952_v21 = vld [vmem:[#allocation5 + $0x1e4] ss:$16 sps:$4 sm:$0xff]  }
  0xc2   :  { %v109_v25 = vmax.f32 %v108_v22, 0.0  ;;  %v870_v22 = vld [vmem:[#allocation5 + $0x2c] ss:$16 sps:$4 sm:$0xff]  }
  0xc3   :  { %686 = vmatprep.subr.bf16.mxu1 %v870_v22  ;;  %v954_v22 = vld [vmem:[#allocation5 + $0x1ec] ss:$16 sps:$4 sm:$0xff]  }
  0xc4   :  { %v110_v26 = vadd.f32 1e-12, %v109_v25  ;;  %v872_v25 = vld [vmem:[#allocation5 + $0x20] ss:$16 sps:$4 sm:$0xff]  }
  0xc5   :  { %646 = vmatpush1.bf16.msra.mxu0 %v872_v25  ;;  %v956_v25 = vld [vmem:[#allocation5 + $0x1e0] ss:$16 sps:$4 sm:$0xff]  }
  0xc6   :  { %958 = vrsqrt.f32 %v110_v26  ;;  %v873_v26 = vld [vmem:[#allocation5 + $0x28] ss:$16 sps:$4 sm:$0xff]   ;;  %647 = vmatprep.subr.bf16.mxu0 %v874_v27 }
  0xc7   :  { %687 = vmatpush1.bf16.msra.mxu1 %v873_v26  ;;  %v957_v26 = vld [vmem:[#allocation5 + $0x1e8] ss:$16 sps:$4 sm:$0xff]  }
  0xc8   :  { %688 = vmatprep.subr.bf16.mxu1 %v876_v28 }
  0xc9   :  { %648 = vmatpush1.bf16.msra.mxu0 %v878_v31  ;;  %v212_v31 = vstv %s787_s18 }
  0xca   :  { %649 = vmatprep.subr.bf16.mxu0 %v880_v33 }
  0xcb   :  { %689 = vmatpush1.bf16.msra.mxu1 %v879_v32 }
  0xcd   :  { %650 = vmatpush1.bf16.msra.mxu0 %v884_v30 }
  0xd0   :  { %v959_v34 = vpop.eup %958 }
  0xd1   :  { %v123_v36 = vrot.slane %v959_v34, %v1059_v4  ;;  %v882_v34 = vld [vmem:[#allocation5 + $0x6c] ss:$16 sps:$4 sm:$0xff]  }
  0xd2   :  { %690 = vmatprep.subr.bf16.mxu1 %v882_v34  ;;  %v215_v34 = vstv %s788_s19 }
  0xd3   :  { %v125_v38 = vmul.f32 %v123_v36, %v118_v35  ;;  %v885_v35 = vld [vmem:[#allocation5 + $0x68] ss:$16 sps:$4 sm:$0xff]   ;;  %v886_v36 = vld [vmem:[#allocation5 + $0x84] ss:$16 sps:$4 sm:$0xff]  }
  0xd4   :  { %691 = vmatpush1.bf16.msra.mxu1 %v885_v35  ;;  %651 = vmatprep.subr.bf16.mxu0 %v886_v36 }
  0xd5   :  { %v130_v39 = vrot.slane %v125_v38, %v1059_v4  ;;  %v134_v41 = vrot.slane %v125_v38, %v1062_v5  ;;  %v890_v38 = vld [vmem:[#allocation5 + $0x80] ss:$16 sps:$4 sm:$0xff]   ;;  %692 = vmatprep.subr.bf16.mxu1 %v888_v37 }
  0xd6   :  { %652 = vmatpush1.bf16.msra.mxu0 %v890_v38  ;;  %v220_v38 = vstv %s789_s20 }
  0xd7   :  { %v137_v40 = vsel %vm63_vm3, %v130_v39, 0.0  ;;  %v138_v42 = vsel %vm64_vm6, %v134_v41, 0.0  ;;  %v891_v39 = vld [vmem:[#allocation5 + $0x88] ss:$16 sps:$4 sm:$0xff]   ;;  %v894_v41 = vld [vmem:[#allocation5 + $0xac] ss:$16 sps:$4 sm:$0xff]  }
  0xd8   :  { %144 = vrot.lane.b32.xlu1 %v137_v40, %s1006_s0  ;;  %v178_v6 = vmul.f32 %v177_v60, %v137_v40  ;;  %v179_v7 = vmul.f32 %v177_v60, %v138_v42  ;;  %693 = vmatpush1.bf16.msra.mxu1 %v891_v39  ;;  %v922_v60 = vld [vmem:[#allocation5 + $0x144] ss:$16 sps:$4 sm:$0xff]  }
  0xd9   :  { %694 = vmatprep.subr.bf16.mxu1 %v894_v41 }
  0xdc   :  { %146 = vrot.lane.b32.xlu1 %v138_v42, %s1006_s0 }
  0xe0   :  { %151 = vrot.lane.b32.xlu1 %v137_v40, %s1007_s2  ;;  %v892_v40 = vld [vmem:[#allocation5 + $0xa4] ss:$16 sps:$4 sm:$0xff]  }
  0xe1   :  { %653 = vmatprep.subr.bf16.mxu0 %v892_v40 }
 0x14a   :  { %v145_v43 = vpop.permute.xlu1 %144 }
 0x14e   :  { %v147_v44 = vpop.permute.xlu1 %146 }
 0x14f   :  { %v150_v45 = vsel %vm148_vm7, %v147_v44, %v145_v43  ;;  %v149_v46 = vsel %vm148_vm7, %v145_v43, %v147_v44  ;;  %v897_v43 = vld [vmem:[#allocation5 + $0xa8] ss:$16 sps:$4 sm:$0xff]   ;;  %v898_v44 = vld [vmem:[#allocation5 + $0xc4] ss:$16 sps:$4 sm:$0xff]  }
 0x150   :  { %158 = vrot.lane.b32.xlu0 %v150_v45, %s1007_s2  ;;  %160 = vrot.lane.b32.xlu1 %v149_v46, %s1007_s2  ;;  %v168_v57 = vmul.f32 %v167_v51, %v150_v45  ;;  %v169_v58 = vmul.f32 %v167_v51, %v149_v46  ;;  %v900_v45 = vld [vmem:[#allocation5 + $0xcc] ss:$16 sps:$4 sm:$0xff]   ;;  %v902_v46 = vld [vmem:[#allocation5 + $0xc0] ss:$16 sps:$4 sm:$0xff]   ;;  %v909_v51 = vld [vmem:[#allocation5 + $0xe8] ss:$16 sps:$4 sm:$0xff]  }
 0x151   :  { %695 = vmatpush1.bf16.msra.mxu1 %v897_v43  ;;  %v225_v43 = vstv %s790_s21 }
 0x152   :  { %v152_v47 = vpop.permute.xlu1 %151  ;;  %696 = vmatprep.subr.bf16.mxu1 %v900_v45 }
 0x154   :  { %153 = vrot.lane.b32.xlu1 %v138_v42, %s1007_s2  ;;  %v896_v42 = vld [vmem:[#allocation5 + $0xa0] ss:$16 sps:$4 sm:$0xff]  }
 0x155   :  { %654 = vmatpush1.bf16.msra.mxu0 %v896_v42 }
 0x156   :  { %655 = vmatprep.subr.bf16.mxu0 %v898_v44 }
 0x159   :  { %656 = vmatpush1.bf16.msra.mxu0 %v902_v46 }
 0x1c2   :  { %v159_v49 = vpop.permute.xlu0 %158  ;;  %v161_v50 = vpop.permute.xlu1 %160 }
 0x1c3   :  { %v162_v52 = vsel %vm155_vm8, %v159_v49, %v161_v50  ;;  %v163_v53 = vsel %vm155_vm8, %v161_v50, %v159_v49  ;;  %v906_v49 = vld [vmem:[#allocation5 + $0xec] ss:$16 sps:$4 sm:$0xff]   ;;  %v908_v50 = vld [vmem:[#allocation5 + $0xe0] ss:$16 sps:$4 sm:$0xff]  }
 0x1c4   :  { %v165_v54 = vmul.f32 %v164_v48, %v163_v53  ;;  %v166_v55 = vmul.f32 %v164_v48, %v162_v52  ;;  %v904_v48 = vld [vmem:[#allocation5 + $0xe4] ss:$16 sps:$4 sm:$0xff]   ;;  %v912_v53 = vld [vmem:[#allocation5 + $0x10c] ss:$16 sps:$4 sm:$0xff]  }
 0x1c5   :  { %657 = vmatprep.subr.bf16.mxu0 %v904_v48  ;;  %v910_v52 = vld [vmem:[#allocation5 + $0x104] ss:$16 sps:$4 sm:$0xff]  }
 0x1c6   :  { %v154_v59 = vpop.permute.xlu1 %153  ;;  %v170_v63 = vadd.f32 %v168_v57, %v165_v54  ;;  %v171_v0 = vadd.f32 %v169_v58, %v166_v55  ;;  %658 = vmatpush1.bf16.msra.mxu0 %v908_v50  ;;  %v914_v54 = vld [vmem:[#allocation5 + $0x100] ss:$16 sps:$4 sm:$0xff]   ;;  %v915_v55 = vld [vmem:[#allocation5 + $0x108] ss:$16 sps:$4 sm:$0xff]   ;;  %v918_v57 = vld [vmem:[#allocation5 + $0x12c] ss:$16 sps:$4 sm:$0xff]  }
 0x1c7   :  { %v156_v61 = vsel %vm155_vm8, %v152_v47, %v154_v59  ;;  %v157_v62 = vsel %vm155_vm8, %v154_v59, %v152_v47  ;;  %v903_v47 = vld [vmem:[#allocation5 + $0xc8] ss:$16 sps:$4 sm:$0xff]   ;;  %659 = vmatprep.subr.bf16.mxu0 %v910_v52  ;;  %v920_v58 = vld [vmem:[#allocation5 + $0x120] ss:$16 sps:$4 sm:$0xff]  }
 0x1c8   :  { %v173_v1 = vmul.f32 %v172_v56, %v157_v62  ;;  %v174_v3 = vmul.f32 %v172_v56, %v156_v61  ;;  %697 = vmatpush1.bf16.msra.mxu1 %v903_v47  ;;  %v916_v56 = vld [vmem:[#allocation5 + $0x124] ss:$16 sps:$4 sm:$0xff]   ;;  %v921_v59 = vld [vmem:[#allocation5 + $0x128] ss:$16 sps:$4 sm:$0xff]   ;;  %v924_v61 = vld [vmem:[#allocation5 + $0x14c] ss:$16 sps:$4 sm:$0xff]  }
 0x1c9   :  { %698 = vmatprep.subr.bf16.mxu1 %v906_v49  ;;  %v926_v62 = vld [vmem:[#allocation5 + $0x140] ss:$16 sps:$4 sm:$0xff]  }
 0x1ca   :  { %v175_v8 = vadd.f32 %v173_v1, %v170_v63  ;;  %v176_v9 = vadd.f32 %v174_v3, %v171_v0  ;;  %660 = vmatpush1.bf16.msra.mxu0 %v914_v54  ;;  %v927_v63 = vld [vmem:[#allocation5 + $0x148] ss:$16 sps:$4 sm:$0xff]   ;;  %v928_v0 = vld [vmem:[#allocation5 + $0x164] ss:$16 sps:$4 sm:$0xff]   ;;  %v930_v1 = vld [vmem:[#allocation5 + $0x16c] ss:$16 sps:$4 sm:$0xff]   ;;  %v230_v54 = vstv %s791_s22 }
 0x1cb   :  { %661 = vmatprep.subr.bf16.mxu0 %v916_v56  ;;  %v932_v3 = vld [vmem:[#allocation5 + $0x160] ss:$16 sps:$4 sm:$0xff]  }
 0x1cc   :  { %v180_v11 = vadd.f32 %v178_v6, %v175_v8  ;;  %v181_v12 = vadd.f32 %v179_v7, %v176_v9  ;;  %699 = vmatpush1.bf16.msra.mxu1 %v909_v51  ;;  %v933_v6 = vld [vmem:[#allocation5 + $0x168] ss:$16 sps:$4 sm:$0xff]   ;;  %v934_v7 = vld [vmem:[#allocation5 + $0x184] ss:$16 sps:$4 sm:$0xff]   ;;  %v936_v8 = vld [vmem:[#allocation5 + $0x18c] ss:$16 sps:$4 sm:$0xff]  }
 0x1cd   :  { %700 = vmatprep.subr.bf16.mxu1 %v912_v53  ;;  %v938_v9 = vld [vmem:[#allocation5 + $0x180] ss:$16 sps:$4 sm:$0xff]  }
 0x1ce   :  { %v183_v13 = vadd.f32 %v182_v10, %v180_v11  ;;  %v184_v14 = vadd.f32 %v182_v10, %v181_v12  ;;  %662 = vmatpush1.bf16.msra.mxu0 %v920_v58  ;;  %v939_v10 = vld [vmem:[#allocation5 + $0x188] ss:$16 sps:$4 sm:$0xff]   ;;  %v940_v11 = vld [vmem:[#allocation5 + $0x1a4] ss:$16 sps:$4 sm:$0xff]   ;;  %v942_v12 = vld [vmem:[#allocation5 + $0x1ac] ss:$16 sps:$4 sm:$0xff]  }
 0x1cf   :  { %663 = vmatprep.subr.bf16.mxu0 %v922_v60 }
 0x1d0   :  { %v185_v18 = vmax.f32 %v183_v13, 0.0  ;;  %v186_v24 = vmax.f32 %v184_v14, 0.0  ;;  %701 = vmatpush1.bf16.msra.mxu1 %v915_v55  ;;  %v944_v13 = vld [vmem:[#allocation5 + $0x1a0] ss:$16 sps:$4 sm:$0xff]   ;;  %v945_v14 = vld [vmem:[#allocation5 + $0x1a8] ss:$16 sps:$4 sm:$0xff]  }
 0x1d1   :  { %702 = vmatprep.subr.bf16.mxu1 %v918_v57 }
 0x1d2   :  { %v1115_v23 = vsel %vm69_vm11, %v185_v18, 0.0  ;;  %v1121_v29 = vsel %vm70_vm14, %v186_v24, 0.0  ;;  %664 = vmatpush1.bf16.msra.mxu0 %v926_v62  ;;  %v950_v18 = vld [vmem:[#allocation5 + $0x1c0] ss:$16 sps:$4 sm:$0xff]   ;;  %v633_v62 = vsub.s32 2, %v1056_v2 }
 0x1d3   :  { %194 = vrot.lane.b32.xlu1 %v1115_v23, %s1006_s0  ;;  %665 = vmatprep.subr.bf16.mxu0 %v928_v0  ;;  %v226_v50 = vmul.f32 %v225_v43, %v1115_v23  ;;  %v227_v51 = vmul.f32 %v225_v43, %v1121_v29 }
 0x1d4   :  { %703 = vmatpush1.bf16.msra.mxu1 %v921_v59 }
 0x1d5   :  { %704 = vmatprep.subr.bf16.mxu1 %v924_v61 }
 0x1d6   :  { %666 = vmatpush1.bf16.msra.mxu0 %v932_v3 }
 0x1d7   :  { %196 = vrot.lane.b32.xlu1 %v1121_v29, %s1006_s0  ;;  %667 = vmatprep.subr.bf16.mxu0 %v934_v7 }
 0x1d8   :  { %705 = vmatpush1.bf16.msra.mxu1 %v927_v63 }
 0x1d9   :  { %706 = vmatprep.subr.bf16.mxu1 %v930_v1 }
 0x1da   :  { %668 = vmatpush1.bf16.msra.mxu0 %v938_v9 }
 0x1db   :  { %669 = vmatprep.subr.bf16.mxu0 %v940_v11 }
 0x1dc   :  { %707 = vmatpush1.bf16.msra.mxu1 %v933_v6 }
 0x1dd   :  { %708 = vmatprep.subr.bf16.mxu1 %v936_v8 }
 0x1de   :  { %670 = vmatpush1.bf16.msra.mxu0 %v944_v13 }
 0x1df   :  { %671 = vmatprep.subr.bf16.mxu0 %v946_v16 }
 0x1e0   :  { %709 = vmatpush1.bf16.msra.mxu1 %v939_v10 }
 0x1e1   :  { %710 = vmatprep.subr.bf16.mxu1 %v942_v12 }
 0x1e2   :  { %672 = vmatpush1.bf16.msra.mxu0 %v950_v18 }
 0x1e3   :  { %673 = vmatprep.subr.bf16.mxu0 %v952_v21 }
 0x1e4   :  { %711 = vmatpush1.bf16.msra.mxu1 %v945_v14 }
 0x1e5   :  { %712 = vmatprep.subr.bf16.mxu1 %v948_v17 }
 0x1e6   :  { %674 = vmatpush1.bf16.msra.mxu0 %v956_v25 }
 0x1e8   :  { %713 = vmatpush1.bf16.msra.mxu1 %v951_v20  ;;  %v729_v20 = vld [vmem:[%s1175_s4] sm:$0xff] }
 0x1e9   :  { %714 = vmatprep.subr.bf16.mxu1 %v954_v22 }
 0x1ec   :  { %715 = vmatpush1.bf16.msra.mxu1 %v957_v26 }
 0x245   :  { %v195_v15 = vpop.permute.xlu1 %194 }
 0x249   :  { %v197_v24 = vpop.permute.xlu1 %196 }
 0x24a   :  { %v199_v27 = vsel %vm148_vm7, %v197_v24, %v195_v15  ;;  %v198_v28 = vsel %vm148_vm7, %v195_v15, %v197_v24  ;;  %v730_v24 = vld [vmem:[%s1175_s4 + $0x8] sm:$0xff] }
 0x24b   :  { %206 = vrot.lane.b32.xlu1 %v199_v27, %s1007_s2  ;;  %208 = vrot.lane.b32.xlu0 %v198_v28, %s1007_s2  ;;  %v216_v39 = vmul.f32 %v215_v34, %v199_v27  ;;  %v217_v40 = vmul.f32 %v215_v34, %v198_v28  ;;  %v731_v28 = vld [vmem:[%s1175_s4 + $0x10] sm:$0xff] }
 0x24f   :  { %200 = vrot.lane.b32.xlu1 %v1115_v23, %s1007_s2  ;;  %202 = vrot.lane.b32.xlu0 %v1121_v29, %s1007_s2  ;;  %v301_v23 = vld [vmem:[%s1174_s3] sm:$0xf]  ;;  %v637_v29 = vsub.s32 3, %v1056_v2 }
 0x250   :  { %v626_v63 = vrot.slane %v301_v23, %v1059_v4  ;;  %v634_v0 = vrot.slane %v301_v23, %v633_v62  ;;  %v630_v1 = vrot.slane %v301_v23, %v1062_v5 }
 0x251   :  { %v638_v3 = vrot.slane %v301_v23, %v637_v29 }
 0x2bd   :  { %v207_v32 = vpop.permute.xlu1 %206  ;;  %v209_v33 = vpop.permute.xlu0 %208 }
 0x2be   :  { %v210_v30 = vsel %vm155_vm8, %v207_v32, %v209_v33  ;;  %v211_v35 = vsel %vm155_vm8, %v209_v33, %v207_v32  ;;  %v732_v33 = vld [vmem:[%s1175_s4 + $0x18] sm:$0xff] }
 0x2bf   :  { %v213_v36 = vmul.f32 %v212_v31, %v211_v35  ;;  %v214_v37 = vmul.f32 %v212_v31, %v210_v30 }
 0x2c1   :  { %v201_v41 = vpop.permute.xlu1 %200  ;;  %v203_v42 = vpop.permute.xlu0 %202  ;;  %v218_v46 = vadd.f32 %v216_v39, %v213_v36  ;;  %v219_v47 = vadd.f32 %v217_v40, %v214_v37 }
 0x2c2   :  { %v204_v44 = vsel %vm155_vm8, %v201_v41, %v203_v42  ;;  %v205_v45 = vsel %vm155_vm8, %v203_v42, %v201_v41 }
 0x2c3   :  { %v221_v48 = vmul.f32 %v220_v38, %v205_v45  ;;  %v222_v49 = vmul.f32 %v220_v38, %v204_v44 }
 0x2c5   :  { %v223_v52 = vadd.f32 %v221_v48, %v218_v46  ;;  %v224_v53 = vadd.f32 %v222_v49, %v219_v47 }
 0x2c7   :  { %v228_v55 = vadd.f32 %v226_v50, %v223_v52  ;;  %v229_v56 = vadd.f32 %v227_v51, %v224_v53 }
 0x2c9   :  { %v231_v57 = vadd.f32 %v230_v54, %v228_v55  ;;  %v232_v58 = vadd.f32 %v230_v54, %v229_v56 }
 0x2cb   :  { %v234_v59 = vmax.f32 %v232_v58, 0.0  ;;  %v233_v60 = vmax.f32 %v231_v57, 0.0 }
 0x2cd   :  { %v236_v61 = vpack.c.bf16 %v234_v59, %v234_v59  ;;  %v235_v19 = vpack.c.bf16 %v233_v60, %v233_v60 }
 0x2cf   :  { %675 = vmatprep.mubr.bf16.mxu0 %v236_v61  ;;  %716 = vmatprep.mubr.bf16.mxu1 %v236_v61 }
 0x2d0   :  { %676 = vmatmul.mubr.bf16.vlgmr.msra.gmra.mrb[0].mxu0 %v235_v19  ;;  %717 = vmatmul.mubr.bf16.vlgmr.msra.gmra.mrb[0].mxu1 %v235_v19 }
 0x3a3   :  { %v677_v6 = vpop.f32.mrb[0].mxu0  ;;  %v718_v7 = vpop.f32.mrb[0].mxu1 }
 0x3a4   :  { %v678_v8 = vadd.f32 %v677_v6, %v626_v63  ;;  %v719_v9 = vadd.f32 %v718_v7, %v634_v0  ;;  %v679_v10 = vpop.f32.mrb[1].mxu0  ;;  %v720_v11 = vpop.f32.mrb[1].mxu1 }
 0x3a5   :  { %v680_v12 = vadd.f32 %v679_v10, %v630_v1  ;;  %v721_v13 = vadd.f32 %v720_v11, %v638_v3  ;;  %v681_v14 = vpop.f32.mrb[2].mxu0  ;;  %v722_v15 = vpop.f32.mrb[2].mxu1 }
 0x3a6   :  { %v725_v16 = vmax.f32 %v678_v8, 0.0  ;;  %v727_v17 = vmax.f32 %v719_v9, 0.0  ;;  %v682_v18 = vpop.f32.mrb[3].mxu0  ;;  %v723_v2 = vpop.f32.mrb[3].mxu1 }
 0x3a7   :  { %v726_v5 = vmax.f32 %v680_v12, 0.0  ;;  %v728_v21 = vmax.f32 %v721_v13, 0.0 }
 0x3a8   :  { %v736_v22 = vrot.slane %v725_v16, %v1059_v4  ;;  %v744_v25 = vrot.slane %v727_v17, %v1059_v4 }
 0x3a9   :  { %v740_v26 = vrot.slane %v726_v5, %v1059_v4  ;;  %v748_v32 = vrot.slane %v728_v21, %v1059_v4 }
 0x3aa   :  { %v749_v27 = vmul.f32 %v736_v22, %v729_v20  ;;  %v751_v34 = vmul.f32 %v744_v25, %v731_v28 }
 0x3ab   :  { %v750_v31 = vmul.f32 %v740_v26, %v730_v24  ;;  %v752_v35 = vmul.f32 %v748_v32, %v732_v33 }
 0x3ad   :  { %v753_v30 = vadd.f32 %v750_v31, %v749_v27 }
 0x3af   :  { %v754_v36 = vadd.f32 %v753_v30, %v751_v34 }
 0x3b1   :  { %v755_v37 = vadd.f32 %v754_v36, %v752_v35 }
 0x3b3   :  { %756 = vadd.xlane.f32.xlu1 %v755_v37 }
 0x440   :  { %v757_v38 = vpop.xlane.xlu1 %756 }
 0x441   :  { %v758_v39 = vrot.slane %v757_v38, 4 }
 0x443   :  { %v759_v40 = vmax.f32 %v757_v38, %v758_v39 }
 0x445   :  { %v760_v41 = vrot.slane %v759_v40, 2 }
 0x447   :  { %v761_v42 = vmax.f32 %v759_v40, %v760_v41 }
 0x449   :  { %v762_v43 = vrot.slane %v761_v42, 1 }
 0x44b   :  { %v763_v44 = vmax.f32 %v761_v42, %v762_v43 }
 0x44d   :  { %v764_v45 = vsub.f32 %v757_v38, %v763_v44 }
 0x44f   :  { %v765_v46 = vmul.f32 1.442695, %v764_v45 }
 0x451   :  { %960 = vpow2.f32 %v765_v46 }
 0x45b   :  { %v961_v4 = vpop.eup %960 }
 0x45c   :  { %v767_v47 = vrot.slane %v961_v4, 4 }
 0x45e   :  { %v768_v48 = vadd.f32 %v961_v4, %v767_v47 }
 0x460   :  { %v769_v49 = vrot.slane %v768_v48, 2 }
 0x462   :  { %v770_v50 = vadd.f32 %v769_v49, %v768_v48 }
 0x464   :  { %v771_v51 = vrot.slane %v770_v50, 1 }
 0x466   :  { %v772_v52 = vadd.f32 %v771_v51, %v770_v50 }
 0x468   :  { %962 = vrcp.f32 %v772_v52 }
 0x472   :  { %v963_v53 = vpop.eup %962 }
 0x473   :  { %v775_v54 = vmul.f32 %v963_v53, %v961_v4 }
 0x475   :  { %776 = vst [vmem:[%s1176_s5] sm:$0xff] %v775_v54 }
 0x476   :  { %781 = vsyncpa [#allocation3], 1 }
 0x477   :  { %782 = vsyncpa [#allocation4], 1 }

</bundles_post_ra>
